<compile_context>
chip_gen: v5e
topology: v5e:2x2
jax: 0.10.0
libtpu: 0.0.40
codegen_flags: <defaults>
</compile_context>

<pallas_src>
import jax
import jax.numpy as jnp
from jax.experimental import pallas as pl
from jax.experimental.pallas import tpu as pltpu


# ----------------------------------------------------------------------------
# helpers
# ----------------------------------------------------------------------------
def _shift_lanes(u, d):
    """Return v with v[:, f] = u[:, f + d], zero-filled outside [0, F)."""
    if d == 0:
        return u
    n, f_dim = u.shape
    if d > 0:
        pad = jnp.zeros((n, d), u.dtype)
        return jnp.concatenate([u[:, d:], pad], axis=1)
    pad = jnp.zeros((n, -d), u.dtype)
    return jnp.concatenate([pad, u[:, : f_dim + d]], axis=1)


def _pick_tile_n(n, cap=256):
    best = None
    for d in range(1, min(n, cap) + 1):
        if n % d == 0 and (d % 8 == 0 or d == n):
            best = d
    if best is None:
        for d in range(1, min(n, cap) + 1):
            if n % d == 0:
                best = d
    return best


# ----------------------------------------------------------------------------
# Pallas kernel 1: one dense-block layer = Conv1d(kf) over F (bias dropped)
# on the fused input [relu(s_j*z_j + t_j), ..., x], emitting the layer's
# pre-activations plus per-tile partial BN statistics.
# ----------------------------------------------------------------------------
def _conv_partial_stats(w_flat, st_flat, x_cnf, z_list, *, c_in, gr, kf, tile_n):
    num_prev = len(z_list)
    c_cur = c_in + num_prev * gr
    _, n_rows, f_dim = x_cnf.shape
    num_tiles = n_rows // tile_n
    pad = kf // 2

    def kernel(*refs):
        it = iter(refs)
        w_ref = next(it)                       # SMEM [gr*c_cur*kf]
        st_ref = next(it) if num_prev else None  # SMEM [num_prev*2*gr]
        x_ref = next(it)                       # VMEM [c_in, tile_n, F]
        z_refs = [next(it) for _ in range(num_prev)]   # each [gr, tile_n, F]
        zout_ref = next(it)                    # [gr, tile_n, F]
        stats_ref = next(it)                   # [1, 2, gr]

        # Input channels in torch dense-cat order (newest activations first,
        # then the original input).  Previous layers' folded BN affine + ReLU
        # is applied on the fly to their stored pre-activations.
        chans = []
        for j in range(num_prev - 1, -1, -1):
            base = j * 2 * gr
            for c in range(gr):
                scale = st_ref[base + c]
                shift = st_ref[base + gr + c]
                chans.append(jnp.maximum(z_refs[j][c] * scale + shift, 0.0))
        for c in range(c_in):
            chans.append(x_ref[c])

        sum_parts = []
        sq_parts = []
        for g in range(gr):
            acc = jnp.zeros((tile_n, f_dim), jnp.float32)
            for k in range(kf):
                u = None
                for c in range(c_cur):
                    wv = w_ref[(g * c_cur + c) * kf + k]
                    term = wv * chans[c]
                    u = term if u is None else u + term
                acc = acc + _shift_lanes(u, k - pad)
            zout_ref[g] = acc
            sum_parts.append(jnp.sum(acc, keepdims=True))        # [1, 1]
            sq_parts.append(jnp.sum(acc * acc, keepdims=True))   # [1, 1]

        s1 = jnp.concatenate(sum_parts, axis=1)   # [1, gr]
        s2 = jnp.concatenate(sq_parts, axis=1)    # [1, gr]
        stats_ref[0] = jnp.concatenate([s1, s2], axis=0)   # [2, gr]

    in_specs = [pl.BlockSpec(memory_space=pltpu.MemorySpace.SMEM)]
    operands = [w_flat]
    if num_prev:
        in_specs.append(pl.BlockSpec(memory_space=pltpu.MemorySpace.SMEM))
        operands.append(st_flat)
    in_specs.append(pl.BlockSpec((c_in, tile_n, f_dim), lambda i: (0, i, 0)))
    operands.append(x_cnf)
    for z in z_list:
        in_specs.append(pl.BlockSpec((gr, tile_n, f_dim), lambda i: (0, i, 0)))
        operands.append(z)

    out_shape = (
        jax.ShapeDtypeStruct((gr, n_rows, f_dim), jnp.float32),
        jax.ShapeDtypeStruct((num_tiles, 2, gr), jnp.float32),
    )
    out_specs = (
        pl.BlockSpec((gr, tile_n, f_dim), lambda i: (0, i, 0)),
        pl.BlockSpec((1, 2, gr), lambda i: (i, 0, 0)),
    )
    return pl.pallas_call(
        kernel,
        out_shape=out_shape,
        grid=(num_tiles,),
        in_specs=in_specs,
        out_specs=out_specs,
        compiler_params=pltpu.CompilerParams(
            dimension_semantics=("parallel",)),
    )(*operands)


# ----------------------------------------------------------------------------
# Pallas kernel 2: final folded BN affine + ReLU (only for the last layer).
# ----------------------------------------------------------------------------
def _affine_relu(z, scale, shift, *, tile_n):
    gr, n_rows, f_dim = z.shape
    num_tiles = n_rows // tile_n
    st_flat = jnp.concatenate([scale, shift]).astype(jnp.float32)

    def kernel(st_ref, z_ref, o_ref):
        for c in range(gr):
            o_ref[c] = jnp.maximum(z_ref[c] * st_ref[c] + st_ref[gr + c], 0.0)

    return pl.pallas_call(
        kernel,
        out_shape=jax.ShapeDtypeStruct((gr, n_rows, f_dim), jnp.float32),
        grid=(num_tiles,),
        in_specs=[
            pl.BlockSpec(memory_space=pltpu.MemorySpace.SMEM),
            pl.BlockSpec((gr, tile_n, f_dim), lambda i: (0, i, 0)),
        ],
        out_specs=pl.BlockSpec((gr, tile_n, f_dim), lambda i: (0, i, 0)),
        compiler_params=pltpu.CompilerParams(
            dimension_semantics=("parallel",)),
    )(st_flat, z)


# ----------------------------------------------------------------------------
# Full TIC forward (tiny per-layer stats reduction in JAX, hot path in Pallas)
# ----------------------------------------------------------------------------
def tic_forward(x, params, kf, tile_n=None):
    """x: [B, C_in, T, F]  ->  [B, gr, T, F]"""
    bsz, c_in, t_len, f_dim = x.shape
    n_rows = bsz * t_len
    gr = params[0][0].shape[0]
    if tile_n is None:
        tile_n = _pick_tile_n(n_rows)
    assert n_rows % tile_n == 0, (n_rows, tile_n)

    # channel-major layout [C, N, F]: F on lanes, rows tiled over the grid.
    # (only the small C_in-channel input is transposed here; the growing slab
    #  is never transposed/concatenated in HBM.)
    x_cnf = jnp.transpose(x, (1, 0, 2, 3)).reshape(c_in, n_rows, f_dim)
    x_cnf = x_cnf.astype(jnp.float32)

    z_list = []     # stored pre-activations, one [gr, N, F] per layer
    st_list = []    # per-layer folded BN (scale, shift), each [gr]
    cnt = float(n_rows * f_dim)
    for layer, (w, _bias, gamma, beta) in enumerate(params):
        # torch Conv1d weight layout [gr, c_cur, kf] -> flat SMEM vector.
        w_flat = w.astype(jnp.float32).reshape(-1)
        if layer > 0:
            st_flat = jnp.concatenate(
                [jnp.concatenate([sc, sh]) for (sc, sh) in st_list]
            ).astype(jnp.float32)
        else:
            st_flat = None

        z_l, pstats = _conv_partial_stats(
            w_flat, st_flat, x_cnf, z_list,
            c_in=c_in, gr=gr, kf=kf, tile_n=tile_n)

        # cross-tile BN statistics (exact global batch stats over N*F).
        tot = jnp.sum(pstats, axis=0)               # [2, gr]
        mean = tot[0] / cnt
        var = tot[1] / cnt - mean * mean
        # Conv bias is dropped: under training-mode BN the mean subtraction
        # cancels it exactly.  Fold BN into a single scale/shift.
        scale = gamma.astype(jnp.float32) * jax.lax.rsqrt(var + 1e-5)
        shift = beta.astype(jnp.float32) - scale * mean

        z_list.append(z_l)
        st_list.append((scale, shift))

    out = _affine_relu(z_list[-1], st_list[-1][0], st_list[-1][1], tile_n=tile_n)
    out = out.reshape(gr, bsz, t_len, f_dim)
    return jnp.transpose(out, (1, 0, 2, 3)).astype(x.dtype)


# ----------------------------------------------------------------------------
# Pure-JAX reference mirroring the torch module (for correctness check)
# ----------------------------------------------------------------------------
def _ref_layer(x_ncf, w, bias, gamma, beta, kf):
    n, _, f_dim = x_ncf.shape
    gr = w.shape[0]
    p = kf // 2
    xp = jnp.pad(x_ncf, ((0, 0), (0, 0), (p, p)))
    z = jnp.zeros((n, gr, f_dim), jnp.float32)
    for k in range(kf):
        z = z + jnp.einsum("ncf,gc->ngf", xp[:, :, k:k + f_dim], w[:, :, k])
    z = z + bias[None, :, None]
    mean = z.mean(axis=(0, 2), keepdims=True)
    var = ((z - mean) ** 2).mean(axis=(0, 2), keepdims=True)
    y = gamma[None, :, None] * (z - mean) * jax.lax.rsqrt(var + 1e-5) \
        + beta[None, :, None]
    return jax.nn.relu(y)


def tic_forward_ref(x, params, kf):
    bsz, c_in, t_len, f_dim = x.shape
    cur = jnp.transpose(x, (0, 2, 1, 3)).reshape(bsz * t_len, c_in, f_dim)
    cur = cur.astype(jnp.float32)
    out = None
    for (w, bias, gamma, beta) in params:
        out = _ref_layer(cur, w, bias, gamma, beta, kf)
        cur = jnp.concatenate([out, cur], axis=1)     # torch: cat((x_, x), 1)
    gr = params[-1][0].shape[0]
    out = out.reshape(bsz, t_len, gr, f_dim)
    return jnp.transpose(out, (0, 2, 1, 3)).astype(x.dtype)


# ----------------------------------------------------------------------------
def init_params(key, in_channels, num_layers, gr, kf):
    params = []
    c = in_channels
    for _ in range(num_layers):
        key, k1, k2, k3, k4 = jax.random.split(key, 5)
        w = 0.2 * jax.random.normal(k1, (gr, c, kf), jnp.float32)   # [out,in,kf]
        bias = 0.1 * jax.random.normal(k2, (gr,), jnp.float32)      # cancels in BN
        gamma = 1.0 + 0.1 * jax.random.normal(k3, (gr,), jnp.float32)
        beta = 0.05 * jax.random.normal(k4, (gr,), jnp.float32)
        params.append((w, bias, gamma, beta))
        c += gr
    return params


if __name__ == "__main__":
    bsz, c_in, t_len, f_dim = 2, 4, 8, 16
    num_layers, gr, kf = 3, 4, 3

    key = jax.random.PRNGKey(0)
    key, kx = jax.random.split(key)
    x = jax.random.normal(kx, (bsz, c_in, t_len, f_dim), jnp.float32)
    params = init_params(key, c_in, num_layers, gr, kf)

    # tile_n=8 -> a 2-step parallel grid over the B*T rows, exercising the
    # cross-tile BatchNorm statistics reduction.
    out = tic_forward(x, params, kf, tile_n=8)
    out = jax.block_until_ready(out)
    assert out.shape == (bsz, gr, t_len, f_dim), out.shape

    ref = jax.block_until_ready(tic_forward_ref(x, params, kf))
    assert jnp.allclose(out, ref, atol=1e-2, rtol=1e-2), (
        float(jnp.max(jnp.abs(out - ref))))

    print("KERNEL_OK")
</pallas_src>

<mosaic_0001>
module attributes {stable_mosaic.version = 11 : i64} {
  func.func @kernel(%arg0: i32, %arg1: memref<48xf32, #tpu.memory_space<smem>>, %arg2: memref<4x8x16xf32, #tpu.memory_space<vmem>>, %arg3: memref<4x8x16xf32, #tpu.memory_space<vmem>>, %arg4: memref<1x2x4xf32, #tpu.memory_space<vmem>>) attributes {dimension_semantics = [#tpu.dimension_semantics<parallel>], iteration_bounds = array<i64: 2>, scalar_prefetch = 0 : i64, scratch_operands = 0 : i64, tpu.core_type = #tpu.core_type<tc>, window_params = [{transform_indices = @transform_0, window_bounds = array<i64: 48>}, {transform_indices = @transform_1, window_bounds = array<i64: 4, 8, 16>}, {transform_indices = @transform_2, window_bounds = array<i64: 4, 8, 16>}, {transform_indices = @transform_3, window_bounds = array<i64: 1, 2, 4>}]} {
    %c0 = arith.constant 0 : index
    %c0_0 = arith.constant 0 : index
    %c0_1 = arith.constant 0 : index
    %0 = vector.load %arg2[%c0, %c0_0, %c0_1] : memref<4x8x16xf32, #tpu.memory_space<vmem>>, vector<1x8x16xf32>
    %1 = vector.shape_cast %0 : vector<1x8x16xf32> to vector<8x16xf32>
    %c1 = arith.constant 1 : index
    %c0_2 = arith.constant 0 : index
    %c0_3 = arith.constant 0 : index
    %2 = vector.load %arg2[%c1, %c0_2, %c0_3] : memref<4x8x16xf32, #tpu.memory_space<vmem>>, vector<1x8x16xf32>
    %3 = vector.shape_cast %2 : vector<1x8x16xf32> to vector<8x16xf32>
    %c2 = arith.constant 2 : index
    %c0_4 = arith.constant 0 : index
    %c0_5 = arith.constant 0 : index
    %4 = vector.load %arg2[%c2, %c0_4, %c0_5] : memref<4x8x16xf32, #tpu.memory_space<vmem>>, vector<1x8x16xf32>
    %5 = vector.shape_cast %4 : vector<1x8x16xf32> to vector<8x16xf32>
    %c3 = arith.constant 3 : index
    %c0_6 = arith.constant 0 : index
    %c0_7 = arith.constant 0 : index
    %6 = vector.load %arg2[%c3, %c0_6, %c0_7] : memref<4x8x16xf32, #tpu.memory_space<vmem>>, vector<1x8x16xf32>
    %7 = vector.shape_cast %6 : vector<1x8x16xf32> to vector<8x16xf32>
    %cst = arith.constant 0.000000e+00 : f32
    %8 = vector.broadcast %cst : f32 to vector<8x16xf32>
    %c0_8 = arith.constant 0 : index
    %9 = memref.load %arg1[%c0_8] : memref<48xf32, #tpu.memory_space<smem>>
    %10 = vector.broadcast %9 : f32 to vector<8x16xf32>
    %11 = arith.mulf %10, %1 : vector<8x16xf32>
    %c3_9 = arith.constant 3 : index
    %12 = memref.load %arg1[%c3_9] : memref<48xf32, #tpu.memory_space<smem>>
    %13 = vector.broadcast %12 : f32 to vector<8x16xf32>
    %14 = arith.mulf %13, %3 : vector<8x16xf32>
    %15 = arith.addf %11, %14 : vector<8x16xf32>
    %c6 = arith.constant 6 : index
    %16 = memref.load %arg1[%c6] : memref<48xf32, #tpu.memory_space<smem>>
    %17 = vector.broadcast %16 : f32 to vector<8x16xf32>
    %18 = arith.mulf %17, %5 : vector<8x16xf32>
    %19 = arith.addf %15, %18 : vector<8x16xf32>
    %c9 = arith.constant 9 : index
    %20 = memref.load %arg1[%c9] : memref<48xf32, #tpu.memory_space<smem>>
    %21 = vector.broadcast %20 : f32 to vector<8x16xf32>
    %22 = arith.mulf %21, %7 : vector<8x16xf32>
    %23 = arith.addf %19, %22 : vector<8x16xf32>
    %cst_10 = arith.constant 0.000000e+00 : f32
    %24 = vector.broadcast %cst_10 : f32 to vector<8x1xf32>
    %25 = vector.extract_strided_slice %23 {offsets = [0, 0], sizes = [8, 15], strides = [1, 1]} : vector<8x16xf32> to vector<8x15xf32>
    %26 = tpu.concatenate %24, %25 in 1 : vector<8x1xf32>, vector<8x15xf32> -> vector<8x16xf32>
    %27 = arith.addf %8, %26 : vector<8x16xf32>
    %c1_11 = arith.constant 1 : index
    %28 = memref.load %arg1[%c1_11] : memref<48xf32, #tpu.memory_space<smem>>
    %29 = vector.broadcast %28 : f32 to vector<8x16xf32>
    %30 = arith.mulf %29, %1 : vector<8x16xf32>
    %c4 = arith.constant 4 : index
    %31 = memref.load %arg1[%c4] : memref<48xf32, #tpu.memory_space<smem>>
    %32 = vector.broadcast %31 : f32 to vector<8x16xf32>
    %33 = arith.mulf %32, %3 : vector<8x16xf32>
    %34 = arith.addf %30, %33 : vector<8x16xf32>
    %c7 = arith.constant 7 : index
    %35 = memref.load %arg1[%c7] : memref<48xf32, #tpu.memory_space<smem>>
    %36 = vector.broadcast %35 : f32 to vector<8x16xf32>
    %37 = arith.mulf %36, %5 : vector<8x16xf32>
    %38 = arith.addf %34, %37 : vector<8x16xf32>
    %c10 = arith.constant 10 : index
    %39 = memref.load %arg1[%c10] : memref<48xf32, #tpu.memory_space<smem>>
    %40 = vector.broadcast %39 : f32 to vector<8x16xf32>
    %41 = arith.mulf %40, %7 : vector<8x16xf32>
    %42 = arith.addf %38, %41 : vector<8x16xf32>
    %43 = arith.addf %27, %42 : vector<8x16xf32>
    %c2_12 = arith.constant 2 : index
    %44 = memref.load %arg1[%c2_12] : memref<48xf32, #tpu.memory_space<smem>>
    %45 = vector.broadcast %44 : f32 to vector<8x16xf32>
    %46 = arith.mulf %45, %1 : vector<8x16xf32>
    %c5 = arith.constant 5 : index
    %47 = memref.load %arg1[%c5] : memref<48xf32, #tpu.memory_space<smem>>
    %48 = vector.broadcast %47 : f32 to vector<8x16xf32>
    %49 = arith.mulf %48, %3 : vector<8x16xf32>
    %50 = arith.addf %46, %49 : vector<8x16xf32>
    %c8 = arith.constant 8 : index
    %51 = memref.load %arg1[%c8] : memref<48xf32, #tpu.memory_space<smem>>
    %52 = vector.broadcast %51 : f32 to vector<8x16xf32>
    %53 = arith.mulf %52, %5 : vector<8x16xf32>
    %54 = arith.addf %50, %53 : vector<8x16xf32>
    %c11 = arith.constant 11 : index
    %55 = memref.load %arg1[%c11] : memref<48xf32, #tpu.memory_space<smem>>
    %56 = vector.broadcast %55 : f32 to vector<8x16xf32>
    %57 = arith.mulf %56, %7 : vector<8x16xf32>
    %58 = arith.addf %54, %57 : vector<8x16xf32>
    %cst_13 = arith.constant 0.000000e+00 : f32
    %59 = vector.broadcast %cst_13 : f32 to vector<8x1xf32>
    %60 = vector.extract_strided_slice %58 {offsets = [0, 1], sizes = [8, 15], strides = [1, 1]} : vector<8x16xf32> to vector<8x15xf32>
    %61 = tpu.concatenate %60, %59 in 1 : vector<8x15xf32>, vector<8x1xf32> -> vector<8x16xf32>
    %62 = arith.addf %43, %61 : vector<8x16xf32>
    %c0_14 = arith.constant 0 : index
    %c0_15 = arith.constant 0 : index
    %c0_16 = arith.constant 0 : index
    %63 = vector.load %arg3[%c0_14, %c0_15, %c0_16] : memref<4x8x16xf32, #tpu.memory_space<vmem>>, vector<1x8x16xf32>
    %64 = vector.shape_cast %63 : vector<1x8x16xf32> to vector<8x16xf32>
    %65 = vector.shape_cast %62 : vector<8x16xf32> to vector<1x8x16xf32>
    tpu.vector_store %arg3[%c0_14, %c0_15, %c0_16], %65 {strides = array<i32>} : memref<4x8x16xf32, #tpu.memory_space<vmem>>, vector<1x8x16xf32>,
    %66 = vector.shape_cast %62 : vector<8x16xf32> to vector<1x8x16xf32>
    %cst_17 = arith.constant dense<0.000000e+00> : vector<1xf32>
    %67 = vector.multi_reduction <add>, %66, %cst_17 [1, 2] : vector<1x8x16xf32> to vector<1xf32>
    %68 = vector.shape_cast %67 : vector<1xf32> to vector<1x1x1xf32>
    %69 = vector.extract %68[0, 0, 0] : f32 from vector<1x1x1xf32>
    %70 = vector.broadcast %69 : f32 to vector<1x1xf32>
    %71 = arith.mulf %62, %62 : vector<8x16xf32>
    %72 = vector.shape_cast %71 : vector<8x16xf32> to vector<1x8x16xf32>
    %cst_18 = arith.constant dense<0.000000e+00> : vector<1xf32>
    %73 = vector.multi_reduction <add>, %72, %cst_18 [1, 2] : vector<1x8x16xf32> to vector<1xf32>
    %74 = vector.shape_cast %73 : vector<1xf32> to vector<1x1x1xf32>
    %75 = vector.extract %74[0, 0, 0] : f32 from vector<1x1x1xf32>
    %76 = vector.broadcast %75 : f32 to vector<1x1xf32>
    %cst_19 = arith.constant 0.000000e+00 : f32
    %77 = vector.broadcast %cst_19 : f32 to vector<8x16xf32>
    %c12 = arith.constant 12 : index
    %78 = memref.load %arg1[%c12] : memref<48xf32, #tpu.memory_space<smem>>
    %79 = vector.broadcast %78 : f32 to vector<8x16xf32>
    %80 = arith.mulf %79, %1 : vector<8x16xf32>
    %c15 = arith.constant 15 : index
    %81 = memref.load %arg1[%c15] : memref<48xf32, #tpu.memory_space<smem>>
    %82 = vector.broadcast %81 : f32 to vector<8x16xf32>
    %83 = arith.mulf %82, %3 : vector<8x16xf32>
    %84 = arith.addf %80, %83 : vector<8x16xf32>
    %c18 = arith.constant 18 : index
    %85 = memref.load %arg1[%c18] : memref<48xf32, #tpu.memory_space<smem>>
    %86 = vector.broadcast %85 : f32 to vector<8x16xf32>
    %87 = arith.mulf %86, %5 : vector<8x16xf32>
    %88 = arith.addf %84, %87 : vector<8x16xf32>
    %c21 = arith.constant 21 : index
    %89 = memref.load %arg1[%c21] : memref<48xf32, #tpu.memory_space<smem>>
    %90 = vector.broadcast %89 : f32 to vector<8x16xf32>
    %91 = arith.mulf %90, %7 : vector<8x16xf32>
    %92 = arith.addf %88, %91 : vector<8x16xf32>
    %cst_20 = arith.constant 0.000000e+00 : f32
    %93 = vector.broadcast %cst_20 : f32 to vector<8x1xf32>
    %94 = vector.extract_strided_slice %92 {offsets = [0, 0], sizes = [8, 15], strides = [1, 1]} : vector<8x16xf32> to vector<8x15xf32>
    %95 = tpu.concatenate %93, %94 in 1 : vector<8x1xf32>, vector<8x15xf32> -> vector<8x16xf32>
    %96 = arith.addf %77, %95 : vector<8x16xf32>
    %c13 = arith.constant 13 : index
    %97 = memref.load %arg1[%c13] : memref<48xf32, #tpu.memory_space<smem>>
    %98 = vector.broadcast %97 : f32 to vector<8x16xf32>
    %99 = arith.mulf %98, %1 : vector<8x16xf32>
    %c16 = arith.constant 16 : index
    %100 = memref.load %arg1[%c16] : memref<48xf32, #tpu.memory_space<smem>>
    %101 = vector.broadcast %100 : f32 to vector<8x16xf32>
    %102 = arith.mulf %101, %3 : vector<8x16xf32>
    %103 = arith.addf %99, %102 : vector<8x16xf32>
    %c19 = arith.constant 19 : index
    %104 = memref.load %arg1[%c19] : memref<48xf32, #tpu.memory_space<smem>>
    %105 = vector.broadcast %104 : f32 to vector<8x16xf32>
    %106 = arith.mulf %105, %5 : vector<8x16xf32>
    %107 = arith.addf %103, %106 : vector<8x16xf32>
    %c22 = arith.constant 22 : index
    %108 = memref.load %arg1[%c22] : memref<48xf32, #tpu.memory_space<smem>>
    %109 = vector.broadcast %108 : f32 to vector<8x16xf32>
    %110 = arith.mulf %109, %7 : vector<8x16xf32>
    %111 = arith.addf %107, %110 : vector<8x16xf32>
    %112 = arith.addf %96, %111 : vector<8x16xf32>
    %c14 = arith.constant 14 : index
    %113 = memref.load %arg1[%c14] : memref<48xf32, #tpu.memory_space<smem>>
    %114 = vector.broadcast %113 : f32 to vector<8x16xf32>
    %115 = arith.mulf %114, %1 : vector<8x16xf32>
    %c17 = arith.constant 17 : index
    %116 = memref.load %arg1[%c17] : memref<48xf32, #tpu.memory_space<smem>>
    %117 = vector.broadcast %116 : f32 to vector<8x16xf32>
    %118 = arith.mulf %117, %3 : vector<8x16xf32>
    %119 = arith.addf %115, %118 : vector<8x16xf32>
    %c20 = arith.constant 20 : index
    %120 = memref.load %arg1[%c20] : memref<48xf32, #tpu.memory_space<smem>>
    %121 = vector.broadcast %120 : f32 to vector<8x16xf32>
    %122 = arith.mulf %121, %5 : vector<8x16xf32>
    %123 = arith.addf %119, %122 : vector<8x16xf32>
    %c23 = arith.constant 23 : index
    %124 = memref.load %arg1[%c23] : memref<48xf32, #tpu.memory_space<smem>>
    %125 = vector.broadcast %124 : f32 to vector<8x16xf32>
    %126 = arith.mulf %125, %7 : vector<8x16xf32>
    %127 = arith.addf %123, %126 : vector<8x16xf32>
    %cst_21 = arith.constant 0.000000e+00 : f32
    %128 = vector.broadcast %cst_21 : f32 to vector<8x1xf32>
    %129 = vector.extract_strided_slice %127 {offsets = [0, 1], sizes = [8, 15], strides = [1, 1]} : vector<8x16xf32> to vector<8x15xf32>
    %130 = tpu.concatenate %129, %128 in 1 : vector<8x15xf32>, vector<8x1xf32> -> vector<8x16xf32>
    %131 = arith.addf %112, %130 : vector<8x16xf32>
    %c1_22 = arith.constant 1 : index
    %c0_23 = arith.constant 0 : index
    %c0_24 = arith.constant 0 : index
    %132 = vector.load %arg3[%c1_22, %c0_23, %c0_24] : memref<4x8x16xf32, #tpu.memory_space<vmem>>, vector<1x8x16xf32>
    %133 = vector.shape_cast %132 : vector<1x8x16xf32> to vector<8x16xf32>
    %134 = vector.shape_cast %131 : vector<8x16xf32> to vector<1x8x16xf32>
    tpu.vector_store %arg3[%c1_22, %c0_23, %c0_24], %134 {strides = array<i32>} : memref<4x8x16xf32, #tpu.memory_space<vmem>>, vector<1x8x16xf32>,
    %135 = vector.shape_cast %131 : vector<8x16xf32> to vector<1x8x16xf32>
    %cst_25 = arith.constant dense<0.000000e+00> : vector<1xf32>
    %136 = vector.multi_reduction <add>, %135, %cst_25 [1, 2] : vector<1x8x16xf32> to vector<1xf32>
    %137 = vector.shape_cast %136 : vector<1xf32> to vector<1x1x1xf32>
    %138 = vector.extract %137[0, 0, 0] : f32 from vector<1x1x1xf32>
    %139 = vector.broadcast %138 : f32 to vector<1x1xf32>
    %140 = arith.mulf %131, %131 : vector<8x16xf32>
    %141 = vector.shape_cast %140 : vector<8x16xf32> to vector<1x8x16xf32>
    %cst_26 = arith.constant dense<0.000000e+00> : vector<1xf32>
    %142 = vector.multi_reduction <add>, %141, %cst_26 [1, 2] : vector<1x8x16xf32> to vector<1xf32>
    %143 = vector.shape_cast %142 : vector<1xf32> to vector<1x1x1xf32>
    %144 = vector.extract %143[0, 0, 0] : f32 from vector<1x1x1xf32>
    %145 = vector.broadcast %144 : f32 to vector<1x1xf32>
    %cst_27 = arith.constant 0.000000e+00 : f32
    %146 = vector.broadcast %cst_27 : f32 to vector<8x16xf32>
    %c24 = arith.constant 24 : index
    %147 = memref.load %arg1[%c24] : memref<48xf32, #tpu.memory_space<smem>>
    %148 = vector.broadcast %147 : f32 to vector<8x16xf32>
    %149 = arith.mulf %148, %1 : vector<8x16xf32>
    %c27 = arith.constant 27 : index
    %150 = memref.load %arg1[%c27] : memref<48xf32, #tpu.memory_space<smem>>
    %151 = vector.broadcast %150 : f32 to vector<8x16xf32>
    %152 = arith.mulf %151, %3 : vector<8x16xf32>
    %153 = arith.addf %149, %152 : vector<8x16xf32>
    %c30 = arith.constant 30 : index
    %154 = memref.load %arg1[%c30] : memref<48xf32, #tpu.memory_space<smem>>
    %155 = vector.broadcast %154 : f32 to vector<8x16xf32>
    %156 = arith.mulf %155, %5 : vector<8x16xf32>
    %157 = arith.addf %153, %156 : vector<8x16xf32>
    %c33 = arith.constant 33 : index
    %158 = memref.load %arg1[%c33] : memref<48xf32, #tpu.memory_space<smem>>
    %159 = vector.broadcast %158 : f32 to vector<8x16xf32>
    %160 = arith.mulf %159, %7 : vector<8x16xf32>
    %161 = arith.addf %157, %160 : vector<8x16xf32>
    %cst_28 = arith.constant 0.000000e+00 : f32
    %162 = vector.broadcast %cst_28 : f32 to vector<8x1xf32>
    %163 = vector.extract_strided_slice %161 {offsets = [0, 0], sizes = [8, 15], strides = [1, 1]} : vector<8x16xf32> to vector<8x15xf32>
    %164 = tpu.concatenate %162, %163 in 1 : vector<8x1xf32>, vector<8x15xf32> -> vector<8x16xf32>
    %165 = arith.addf %146, %164 : vector<8x16xf32>
    %c25 = arith.constant 25 : index
    %166 = memref.load %arg1[%c25] : memref<48xf32, #tpu.memory_space<smem>>
    %167 = vector.broadcast %166 : f32 to vector<8x16xf32>
    %168 = arith.mulf %167, %1 : vector<8x16xf32>
    %c28 = arith.constant 28 : index
    %169 = memref.load %arg1[%c28] : memref<48xf32, #tpu.memory_space<smem>>
    %170 = vector.broadcast %169 : f32 to vector<8x16xf32>
    %171 = arith.mulf %170, %3 : vector<8x16xf32>
    %172 = arith.addf %168, %171 : vector<8x16xf32>
    %c31 = arith.constant 31 : index
    %173 = memref.load %arg1[%c31] : memref<48xf32, #tpu.memory_space<smem>>
    %174 = vector.broadcast %173 : f32 to vector<8x16xf32>
    %175 = arith.mulf %174, %5 : vector<8x16xf32>
    %176 = arith.addf %172, %175 : vector<8x16xf32>
    %c34 = arith.constant 34 : index
    %177 = memref.load %arg1[%c34] : memref<48xf32, #tpu.memory_space<smem>>
    %178 = vector.broadcast %177 : f32 to vector<8x16xf32>
    %179 = arith.mulf %178, %7 : vector<8x16xf32>
    %180 = arith.addf %176, %179 : vector<8x16xf32>
    %181 = arith.addf %165, %180 : vector<8x16xf32>
    %c26 = arith.constant 26 : index
    %182 = memref.load %arg1[%c26] : memref<48xf32, #tpu.memory_space<smem>>
    %183 = vector.broadcast %182 : f32 to vector<8x16xf32>
    %184 = arith.mulf %183, %1 : vector<8x16xf32>
    %c29 = arith.constant 29 : index
    %185 = memref.load %arg1[%c29] : memref<48xf32, #tpu.memory_space<smem>>
    %186 = vector.broadcast %185 : f32 to vector<8x16xf32>
    %187 = arith.mulf %186, %3 : vector<8x16xf32>
    %188 = arith.addf %184, %187 : vector<8x16xf32>
    %c32 = arith.constant 32 : index
    %189 = memref.load %arg1[%c32] : memref<48xf32, #tpu.memory_space<smem>>
    %190 = vector.broadcast %189 : f32 to vector<8x16xf32>
    %191 = arith.mulf %190, %5 : vector<8x16xf32>
    %192 = arith.addf %188, %191 : vector<8x16xf32>
    %c35 = arith.constant 35 : index
    %193 = memref.load %arg1[%c35] : memref<48xf32, #tpu.memory_space<smem>>
    %194 = vector.broadcast %193 : f32 to vector<8x16xf32>
    %195 = arith.mulf %194, %7 : vector<8x16xf32>
    %196 = arith.addf %192, %195 : vector<8x16xf32>
    %cst_29 = arith.constant 0.000000e+00 : f32
    %197 = vector.broadcast %cst_29 : f32 to vector<8x1xf32>
    %198 = vector.extract_strided_slice %196 {offsets = [0, 1], sizes = [8, 15], strides = [1, 1]} : vector<8x16xf32> to vector<8x15xf32>
    %199 = tpu.concatenate %198, %197 in 1 : vector<8x15xf32>, vector<8x1xf32> -> vector<8x16xf32>
    %200 = arith.addf %181, %199 : vector<8x16xf32>
    %c2_30 = arith.constant 2 : index
    %c0_31 = arith.constant 0 : index
    %c0_32 = arith.constant 0 : index
    %201 = vector.load %arg3[%c2_30, %c0_31, %c0_32] : memref<4x8x16xf32, #tpu.memory_space<vmem>>, vector<1x8x16xf32>
    %202 = vector.shape_cast %201 : vector<1x8x16xf32> to vector<8x16xf32>
    %203 = vector.shape_cast %200 : vector<8x16xf32> to vector<1x8x16xf32>
    tpu.vector_store %arg3[%c2_30, %c0_31, %c0_32], %203 {strides = array<i32>} : memref<4x8x16xf32, #tpu.memory_space<vmem>>, vector<1x8x16xf32>,
    %204 = vector.shape_cast %200 : vector<8x16xf32> to vector<1x8x16xf32>
    %cst_33 = arith.constant dense<0.000000e+00> : vector<1xf32>
    %205 = vector.multi_reduction <add>, %204, %cst_33 [1, 2] : vector<1x8x16xf32> to vector<1xf32>
    %206 = vector.shape_cast %205 : vector<1xf32> to vector<1x1x1xf32>
    %207 = vector.extract %206[0, 0, 0] : f32 from vector<1x1x1xf32>
    %208 = vector.broadcast %207 : f32 to vector<1x1xf32>
    %209 = arith.mulf %200, %200 : vector<8x16xf32>
    %210 = vector.shape_cast %209 : vector<8x16xf32> to vector<1x8x16xf32>
    %cst_34 = arith.constant dense<0.000000e+00> : vector<1xf32>
    %211 = vector.multi_reduction <add>, %210, %cst_34 [1, 2] : vector<1x8x16xf32> to vector<1xf32>
    %212 = vector.shape_cast %211 : vector<1xf32> to vector<1x1x1xf32>
    %213 = vector.extract %212[0, 0, 0] : f32 from vector<1x1x1xf32>
    %214 = vector.broadcast %213 : f32 to vector<1x1xf32>
    %cst_35 = arith.constant 0.000000e+00 : f32
    %215 = vector.broadcast %cst_35 : f32 to vector<8x16xf32>
    %c36 = arith.constant 36 : index
    %216 = memref.load %arg1[%c36] : memref<48xf32, #tpu.memory_space<smem>>
    %217 = vector.broadcast %216 : f32 to vector<8x16xf32>
    %218 = arith.mulf %217, %1 : vector<8x16xf32>
    %c39 = arith.constant 39 : index
    %219 = memref.load %arg1[%c39] : memref<48xf32, #tpu.memory_space<smem>>
    %220 = vector.broadcast %219 : f32 to vector<8x16xf32>
    %221 = arith.mulf %220, %3 : vector<8x16xf32>
    %222 = arith.addf %218, %221 : vector<8x16xf32>
    %c42 = arith.constant 42 : index
    %223 = memref.load %arg1[%c42] : memref<48xf32, #tpu.memory_space<smem>>
    %224 = vector.broadcast %223 : f32 to vector<8x16xf32>
    %225 = arith.mulf %224, %5 : vector<8x16xf32>
    %226 = arith.addf %222, %225 : vector<8x16xf32>
    %c45 = arith.constant 45 : index
    %227 = memref.load %arg1[%c45] : memref<48xf32, #tpu.memory_space<smem>>
    %228 = vector.broadcast %227 : f32 to vector<8x16xf32>
    %229 = arith.mulf %228, %7 : vector<8x16xf32>
    %230 = arith.addf %226, %229 : vector<8x16xf32>
    %cst_36 = arith.constant 0.000000e+00 : f32
    %231 = vector.broadcast %cst_36 : f32 to vector<8x1xf32>
    %232 = vector.extract_strided_slice %230 {offsets = [0, 0], sizes = [8, 15], strides = [1, 1]} : vector<8x16xf32> to vector<8x15xf32>
    %233 = tpu.concatenate %231, %232 in 1 : vector<8x1xf32>, vector<8x15xf32> -> vector<8x16xf32>
    %234 = arith.addf %215, %233 : vector<8x16xf32>
    %c37 = arith.constant 37 : index
    %235 = memref.load %arg1[%c37] : memref<48xf32, #tpu.memory_space<smem>>
    %236 = vector.broadcast %235 : f32 to vector<8x16xf32>
    %237 = arith.mulf %236, %1 : vector<8x16xf32>
    %c40 = arith.constant 40 : index
    %238 = memref.load %arg1[%c40] : memref<48xf32, #tpu.memory_space<smem>>
    %239 = vector.broadcast %238 : f32 to vector<8x16xf32>
    %240 = arith.mulf %239, %3 : vector<8x16xf32>
    %241 = arith.addf %237, %240 : vector<8x16xf32>
    %c43 = arith.constant 43 : index
    %242 = memref.load %arg1[%c43] : memref<48xf32, #tpu.memory_space<smem>>
    %243 = vector.broadcast %242 : f32 to vector<8x16xf32>
    %244 = arith.mulf %243, %5 : vector<8x16xf32>
    %245 = arith.addf %241, %244 : vector<8x16xf32>
    %c46 = arith.constant 46 : index
    %246 = memref.load %arg1[%c46] : memref<48xf32, #tpu.memory_space<smem>>
    %247 = vector.broadcast %246 : f32 to vector<8x16xf32>
    %248 = arith.mulf %247, %7 : vector<8x16xf32>
    %249 = arith.addf %245, %248 : vector<8x16xf32>
    %250 = arith.addf %234, %249 : vector<8x16xf32>
    %c38 = arith.constant 38 : index
    %251 = memref.load %arg1[%c38] : memref<48xf32, #tpu.memory_space<smem>>
    %252 = vector.broadcast %251 : f32 to vector<8x16xf32>
    %253 = arith.mulf %252, %1 : vector<8x16xf32>
    %c41 = arith.constant 41 : index
    %254 = memref.load %arg1[%c41] : memref<48xf32, #tpu.memory_space<smem>>
    %255 = vector.broadcast %254 : f32 to vector<8x16xf32>
    %256 = arith.mulf %255, %3 : vector<8x16xf32>
    %257 = arith.addf %253, %256 : vector<8x16xf32>
    %c44 = arith.constant 44 : index
    %258 = memref.load %arg1[%c44] : memref<48xf32, #tpu.memory_space<smem>>
    %259 = vector.broadcast %258 : f32 to vector<8x16xf32>
    %260 = arith.mulf %259, %5 : vector<8x16xf32>
    %261 = arith.addf %257, %260 : vector<8x16xf32>
    %c47 = arith.constant 47 : index
    %262 = memref.load %arg1[%c47] : memref<48xf32, #tpu.memory_space<smem>>
    %263 = vector.broadcast %262 : f32 to vector<8x16xf32>
    %264 = arith.mulf %263, %7 : vector<8x16xf32>
    %265 = arith.addf %261, %264 : vector<8x16xf32>
    %cst_37 = arith.constant 0.000000e+00 : f32
    %266 = vector.broadcast %cst_37 : f32 to vector<8x1xf32>
    %267 = vector.extract_strided_slice %265 {offsets = [0, 1], sizes = [8, 15], strides = [1, 1]} : vector<8x16xf32> to vector<8x15xf32>
    %268 = tpu.concatenate %267, %266 in 1 : vector<8x15xf32>, vector<8x1xf32> -> vector<8x16xf32>
    %269 = arith.addf %250, %268 : vector<8x16xf32>
    %c3_38 = arith.constant 3 : index
    %c0_39 = arith.constant 0 : index
    %c0_40 = arith.constant 0 : index
    %270 = vector.load %arg3[%c3_38, %c0_39, %c0_40] : memref<4x8x16xf32, #tpu.memory_space<vmem>>, vector<1x8x16xf32>
    %271 = vector.shape_cast %270 : vector<1x8x16xf32> to vector<8x16xf32>
    %272 = vector.shape_cast %269 : vector<8x16xf32> to vector<1x8x16xf32>
    tpu.vector_store %arg3[%c3_38, %c0_39, %c0_40], %272 {strides = array<i32>} : memref<4x8x16xf32, #tpu.memory_space<vmem>>, vector<1x8x16xf32>,
    %273 = vector.shape_cast %269 : vector<8x16xf32> to vector<1x8x16xf32>
    %cst_41 = arith.constant dense<0.000000e+00> : vector<1xf32>
    %274 = vector.multi_reduction <add>, %273, %cst_41 [1, 2] : vector<1x8x16xf32> to vector<1xf32>
    %275 = vector.shape_cast %274 : vector<1xf32> to vector<1x1x1xf32>
    %276 = vector.extract %275[0, 0, 0] : f32 from vector<1x1x1xf32>
    %277 = vector.broadcast %276 : f32 to vector<1x1xf32>
    %278 = arith.mulf %269, %269 : vector<8x16xf32>
    %279 = vector.shape_cast %278 : vector<8x16xf32> to vector<1x8x16xf32>
    %cst_42 = arith.constant dense<0.000000e+00> : vector<1xf32>
    %280 = vector.multi_reduction <add>, %279, %cst_42 [1, 2] : vector<1x8x16xf32> to vector<1xf32>
    %281 = vector.shape_cast %280 : vector<1xf32> to vector<1x1x1xf32>
    %282 = vector.extract %281[0, 0, 0] : f32 from vector<1x1x1xf32>
    %283 = vector.broadcast %282 : f32 to vector<1x1xf32>
    %284 = tpu.concatenate %70, %139, %208, %277 in 1 : vector<1x1xf32>, vector<1x1xf32>, vector<1x1xf32>, vector<1x1xf32> -> vector<1x4xf32>
    %285 = tpu.concatenate %76, %145, %214, %283 in 1 : vector<1x1xf32>, vector<1x1xf32>, vector<1x1xf32>, vector<1x1xf32> -> vector<1x4xf32>
    %286 = tpu.concatenate %284, %285 in 0 : vector<1x4xf32>, vector<1x4xf32> -> vector<2x4xf32>
    %c0_43 = arith.constant 0 : index
    %c0_44 = arith.constant 0 : index
    %c0_45 = arith.constant 0 : index
    %287 = vector.load %arg4[%c0_43, %c0_44, %c0_45] : memref<1x2x4xf32, #tpu.memory_space<vmem>>, vector<1x2x4xf32>
    %288 = vector.shape_cast %287 : vector<1x2x4xf32> to vector<2x4xf32>
    %289 = vector.shape_cast %286 : vector<2x4xf32> to vector<1x2x4xf32>
    tpu.vector_store %arg4[%c0_43, %c0_44, %c0_45], %289 {strides = array<i32>} : memref<1x2x4xf32, #tpu.memory_space<vmem>>, vector<1x2x4xf32>,
    return
  }
  func.func @transform_0(%arg0: i32) -> i32 {
    %c0_i32 = arith.constant 0 : i32
    %c0_i32_0 = arith.constant 0 : i32
    return %c0_i32 : i32
  }
  func.func @transform_1(%arg0: i32) -> (i32, i32, i32) {
    %c0_i32 = arith.constant 0 : i32
    %c0_i32_0 = arith.constant 0 : i32
    %c0_i32_1 = arith.constant 0 : i32
    return %c0_i32, %arg0, %c0_i32_0 : i32, i32, i32
  }
  func.func @transform_2(%arg0: i32) -> (i32, i32, i32) {
    %c0_i32 = arith.constant 0 : i32
    %c0_i32_0 = arith.constant 0 : i32
    %c0_i32_1 = arith.constant 0 : i32
    return %c0_i32, %arg0, %c0_i32_0 : i32, i32, i32
  }
  func.func @transform_3(%arg0: i32) -> (i32, i32, i32) {
    %c0_i32 = arith.constant 0 : i32
    %c0_i32_0 = arith.constant 0 : i32
    %c0_i32_1 = arith.constant 0 : i32
    return %arg0, %c0_i32, %c0_i32_0 : i32, i32, i32
  }
}

</mosaic_0001>

<bundles_post_ra>
// kernel: tpu_custom_call.1
= control target key start
LH: loop header
LB: loop body
LE: loop exit
PB: predicated region body
PF: predicated region fallthrough
CT: control target
= control target key end

     0   :  { %9 = vsyncpa [#allocation5], 0  ;;  %s1333_s0 = inlined_call_operand.hbm [shape: f32[48], index: 0, kind: input, shape index: {}]   ;;  %s1334_s1 = inlined_call_operand.hbm [shape: f32[4,16,16], index: 1, kind: input, shape index: {}]   ;;  %s1335_s2 = inlined_call_operand.hbm [shape: f32[4,16,16], index: 2, kind: output, shape index: {0}]   ;;  %s1336_s3 = inlined_call_operand.hbm [shape: f32[2,2,4], index: 3, kind: output, shape index: {1}]  }
   0x1   :  { %10 = vsyncpa [#allocation3], 0 }
   0x2   :  { %12 = vsyncpa [#allocation3 + $0x1], 0 }
   0x3   :  { %13 = vsyncpa [#allocation4], 0 }
   0x4   :  { %15 = vsyncpa [#allocation4 + $0x1], 0 }
   0x5   :  { %16 = vsyncpa [#allocation9], 0 }
   0x6   :  { %18 = vsyncpa [#allocation9 + $0x1], 0  ;;  %s1057_s12 = smov 0   ;;  %s1059_s13 = smov 0  }
   0x7   :  { %s1061_s14 = smov 0   ;;  %s1063_s15 = smov 0  }
   0x8 LB: > { %s1078_s16 = sadd.s32 4294967295, %s1026_s15   ;;  %s723_s17 = sadd.s32 4294967294, %s1026_s15   ;;  %s1026_s15 = sphi %s1063_s15, %s1347_s15   ;;  %s1022_s14 = sphi %s1061_s14, %s1346_s14   ;;  %s1018_s13 = sphi %s1059_s13, %s1345_s13   ;;  %s1014_s12 = sphi %s1057_s12, %s1344_s12  }
   0x9   : > { %s1082_s18 = sadd.s32 1, %s1026_s15   ;;  %s52_s19 = sadd.s32 1, %s1022_s14 }
   0xa   : > { %s49_s20 = ssub.s32 %s1026_s15, %s1082_s18  ;;  %p59_p0 = scmp.ne.s32.totalorder %s1022_s14, %s1018_s13 }
   0xb   : > { %p50_p1 = scmp.eq.s32.totalorder %s49_s20, 0  ;;  %p60_p2 = scmp.eq.s32.totalorder %s1026_s15, 0 }
   0xc   : > { %p65_p3 = scmp.ne.s32.totalorder %s1018_s13, %s1014_s12  ;;  %p66_p4 = scmp.eq.s32.totalorder %s1078_s16, 0 }
   0xd   : > { %s1094_s21 = scalar_select %p50_p1, %s1022_s14, %s52_s19  }
   0xe   : > { %p1096_p5 = por %p60_p2, %p59_p0  ;;  %p1102_p6 = por %p66_p4, %p65_p3 }
   0xf   : > { %p89_p7 = scmp.eq.s32.totalorder %s1078_s16, 1  ;;  %p95_p8 = scmp.eq.s32.totalorder %s723_s17, 1 }
  0x10   : > { %p724_p9 = scmp.ge.s32.totalorder %s1026_s15, 1  ;;  %p128_p10 = scmp.lt.s32.totalorder %s1026_s15, 3 }
  0x11   : > { %p1109_p11 = por %p89_p7, %p59_p0  ;;  %p1113_p12 = por %p95_p8, %p65_p3 }
  0x12   : > { %p1117_p13 = pnand %p724_p9, %p128_p10  ;;  %s140_s29 = sshll.u32 %s1333_s0, 4  ;;  %s141_s29 = int_to_ptr.hbm [resolvable:$true] %s140_s29 }
  0x13   : > { %p835_p2 = scmp.lt.s32.totalorder %s1026_s15, 2  ;;  %s151_s30 = sand.u32 1, %s1022_s14  }
  0x14   : > { %p819_p1 = pneg %p1117_p13  ;;  %s727_s5 = sshll.u32 %s151_s30, 5 }
  0x15   : > { %p1133_p3 = pnand %p835_p2, %p1096_p5  ;;  %s1028_s6 = smov [#allocation2]  }
  0x16   : > { %p820_p7 = pnand %p819_p1, %p66_p4  ;;  %s728_s7 = sshll.u32 %s1026_s15, 3 }
  0x17   : > { %s155_s8 = scalar_lea.vmem [#allocation6], %s727_s5  ;;  %s159_s17 = scalar_lea.hbm %s1334_s1, %s728_s7 }
  0x18   : > { %822 = dma.hbm_to_smem (!%p820_p7), %s141_s29, 16, %s1028_s6, [#allocation5]  }
  0x19   : > { %s162_s9 = sshll.u32 %s155_s8, 4  ;;  %s160_s19 = sshll.u32 %s159_s17, 4  ;;  %s163_s9 = int_to_ptr.vmem [resolvable:$true] %s162_s9  ;;  %s161_s19 = int_to_ptr.hbm [resolvable:$true] %s160_s19 }
  0x1a   : > { %s152_s20 = scalar_lea.sflag [#allocation3], %s151_s30  ;;  %s894_s22 = sshra.s32 %s161_s19, 4  ;;  %s895_s22 = int_to_ptr.hbm [resolvable:$true] %s894_s22 }
  0x1b   : > { %s896_s27 = scalar_lea.hbm %s895_s22, 32  ;;  %p898_p8 = pneg %p1133_p3 }
  0x1c   : > { %p897_p5 = scmp.ne.s32.totalorder %s895_s22, %s896_s27  ;;  %s901_s5 = scalar_lea.hbm %s1334_s1, 64 }
  0x1d   : > { %p902_p1 = scmp.lt.s32.totalorder %s895_s22, %s1334_s1  ;;  %p903_p2 = scmp.lt.s32.totalorder %s901_s5, %s896_s27 }
  0x1e   : > { %p899_p9 = pnand %p898_p8, %p897_p5 }
  0x1f   : > { %p904_p7 = por %p903_p2, %p902_p1 }
  0x20   : > { %p900_p10 = pneg %p899_p9 }
  0x22   : > { %p905_p0 = pnand %p904_p7, %p900_p10 }
  0x24   : > { %908 = shalt.err (!%p905_p0)
}
  0x25   : > { %s1029_s30 = smov 256   ;;  %s1030_s7 = smov 128  }
  0x26   : > { %s1031_s10 = smov 8   ;;  %174 = sbr.rel (%p1117_p13) target bundleno = 407 (0x197), region = 28 }
  0x27   : > { %826 = dma.hbm_to_vmem [thread:$0]  (!%p1133_p3), %s161_s19, 512, %s163_s9, %s152_s20, %s1029_s30, %s1030_s7, %s1031_s10  }
  0x2b   : > { %997 = dma.done.wait (%p66_p4), [#allocation5], 16  }
  0x2c   : > { %999 = vsyncadd (%p66_p4), [#allocation5], 4294967280  ;;  %s1158_s11 = sand.u32 1, %s1018_s13  }
  0x2d   : > { %s731_s17 = sshll.u32 %s1158_s11, 5  ;;  %s182_s22 = scalar_lea.sflag [#allocation3], %s1158_s11 }
  0x2e   : > { %s185_s4 = scalar_lea.vmem [#allocation6], %s731_s17 }
  0x2f   : > { %1001 = dma.done.wait (%p1102_p6), %s182_s22, 512  }
  0x30   : > { %1003 = vsyncadd (%p1102_p6), %s182_s22, 4294966784 }
  0x31   : > { %191 = sfence }
  0x32   : > { %s761_s26 = sld [smem:[#allocation2 + $0x18]]  ;;  %v1168_v0 = vld [vmem:[%s185_s4] sm:$0xff]  ;;  %v1170_v1 = vld [vmem:[%s185_s4 + $0x8] sm:$0xff]  ;;  %v1172_v2 = vld [vmem:[%s185_s4 + $0x10] sm:$0xff]  ;;  %vm241_vm0 = vcmask 7168   ;;  %vm279_vm1 = vcmask 121856  }
  0x33   : > { %s762_s9 = sld [smem:[#allocation2 + $0x1b]]  ;;  %v1174_v4 = vld [vmem:[%s185_s4 + $0x18] sm:$0xff]  ;;  %vm282_vm2 = vcmask 130048  }
  0x34   : > { %s763_s19 = sld [smem:[#allocation2 + $0x1e]] }
  0x35   : > { %s764_s20 = sld [smem:[#allocation2 + $0x21]] }
  0x36   : > { %s222_s27 = sld [smem:[#allocation2]] }
  0x37   : > { %s737_s28 = sld [smem:[#allocation2 + $0x3]] }
  0x38   : > { %v391_v3 = vstv %s761_s26  ;;  %s738_s29 = sld [smem:[#allocation2 + $0x6]]  ;;  %s1032_s26 = smov 1  }
  0x39   : > { %v392_v5 = vmul.f32 %v391_v3, %v1168_v0  ;;  %v394_v6 = vstv %s762_s9  ;;  %s739_s23 = sld [smem:[#allocation2 + $0x9]] }
  0x3a   : > { %v395_v7 = vmul.f32 %v1170_v1, %v394_v6  ;;  %v398_v8 = vstv %s763_s19  ;;  %s744_s5 = sld [smem:[#allocation2 + $0x2]] }
  0x3b   : > { %v399_v9 = vmul.f32 %v1172_v2, %v398_v8  ;;  %v402_v10 = vstv %s764_s20  ;;  %s745_s6 = sld [smem:[#allocation2 + $0x5]] }
  0x3c   : > { %v396_v11 = vadd.f32 %v395_v7, %v392_v5  ;;  %v403_v12 = vmul.f32 %v1174_v4, %v402_v10  ;;  %v223_v13 = vstv %s222_s27  ;;  %s746_s8 = sld [smem:[#allocation2 + $0x8]] }
  0x3d   : > { %v224_v14 = vmul.f32 %v223_v13, %v1168_v0  ;;  %v226_v15 = vstv %s737_s28  ;;  %s747_s30 = sld [smem:[#allocation2 + $0xb]] }
  0x3e   : > { %v400_v16 = vadd.f32 %v399_v9, %v396_v11  ;;  %v227_v17 = vmul.f32 %v1170_v1, %v226_v15  ;;  %v230_v18 = vstv %s738_s29  ;;  %s748_s7 = sld [smem:[#allocation2 + $0xc]] }
  0x3f   : > { %v231_v19 = vmul.f32 %v1172_v2, %v230_v18  ;;  %v234_v20 = vstv %s739_s23  ;;  %s749_s10 = sld [smem:[#allocation2 + $0xf]] }
  0x40   : > { %v404_v21 = vadd.f32 %v403_v12, %v400_v16  ;;  %v228_v22 = vadd.f32 %v227_v17, %v224_v14  ;;  %v235_v23 = vmul.f32 %v1174_v4, %v234_v20  ;;  %v261_v24 = vstv %s744_s5  ;;  %s750_s22 = sld [smem:[#allocation2 + $0x12]] }
  0x41   : > { %v262_v25 = vmul.f32 %v261_v24, %v1168_v0  ;;  %v264_v26 = vstv %s745_s6  ;;  %s751_s4 = sld [smem:[#allocation2 + $0x15]]  ;;  %s1033_s6 = smov 127  }
  0x42   : > { %406 = vrot.lane.b32.xlu1 %v404_v21, %s1032_s26  ;;  %v232_v27 = vadd.f32 %v231_v19, %v228_v22  ;;  %v265_v28 = vmul.f32 %v1170_v1, %v264_v26  ;;  %v268_v29 = vstv %s746_s8  ;;  %s769_s9 = sld [smem:[#allocation2 + $0x1a]] }
  0x43   : > { %v269_v30 = vmul.f32 %v1172_v2, %v268_v29  ;;  %v272_v31 = vstv %s747_s30  ;;  %s770_s19 = sld [smem:[#allocation2 + $0x1d]] }
  0x44   : > { %v236_v32 = vadd.f32 %v235_v23, %v232_v27  ;;  %v266_v33 = vadd.f32 %v265_v28, %v262_v25  ;;  %v273_v34 = vmul.f32 %v1174_v4, %v272_v31  ;;  %v308_v35 = vstv %s748_s7  ;;  %s771_s20 = sld [smem:[#allocation2 + $0x20]] }
  0x45   : > { %v309_v36 = vmul.f32 %v308_v35, %v1168_v0  ;;  %v311_v37 = vstv %s749_s10  ;;  %s1190_s27 = sld [smem:[#allocation2 + $0x23]] }
  0x46   : > { %238 = vrot.lane.b32.xlu0 %v236_v32, %s1032_s26  ;;  %v270_v38 = vadd.f32 %v269_v30, %v266_v33  ;;  %v312_v39 = vmul.f32 %v1170_v1, %v311_v37  ;;  %v315_v40 = vstv %s750_s22  ;;  %s782_s28 = sld [smem:[#allocation2 + $0x26]] }
  0x47   : > { %v316_v41 = vmul.f32 %v1172_v2, %v315_v40  ;;  %v319_v42 = vstv %s751_s4  ;;  %s783_s29 = sld [smem:[#allocation2 + $0x29]] }
  0x48   : > { %v274_v43 = vadd.f32 %v273_v34, %v270_v38  ;;  %v313_v44 = vadd.f32 %v312_v39, %v309_v36  ;;  %v320_v45 = vmul.f32 %v1174_v4, %v319_v42  ;;  %v428_v46 = vstv %s769_s9  ;;  %s784_s23 = sld [smem:[#allocation2 + $0x2c]] }
  0x49   : > { %v429_v47 = vmul.f32 %v428_v46, %v1168_v0  ;;  %v431_v48 = vstv %s770_s19  ;;  %s785_s5 = sld [smem:[#allocation2 + $0x2f]] }
  0x4a   : > { %276 = vrot.lane.b32.xlu1 %v274_v43, %s1033_s6  ;;  %v317_v49 = vadd.f32 %v316_v41, %v313_v44  ;;  %v432_v50 = vmul.f32 %v1170_v1, %v431_v48  ;;  %v435_v51 = vstv %s771_s20  ;;  %s756_s8 = sld [smem:[#allocation2 + $0xe]] }
  0x4b   : > { %v436_v52 = vmul.f32 %v1172_v2, %v435_v51  ;;  %v439_v53 = vstv %s1190_s27  ;;  %s757_s30 = sld [smem:[#allocation2 + $0x11]] }
  0x4c   : > { %v321_v54 = vadd.f32 %v320_v45, %v317_v49  ;;  %v433_v55 = vadd.f32 %v432_v50, %v429_v47  ;;  %v511_v56 = vstv %s782_s28  ;;  %s758_s7 = sld [smem:[#allocation2 + $0x14]]  ;;  %v440_v60 = vmul.f32 %v1174_v4, %v439_v53 }
  0x4d   : > { %v512_v57 = vmul.f32 %v511_v56, %v1168_v0  ;;  %v514_v58 = vstv %s783_s29  ;;  %s759_s10 = sld [smem:[#allocation2 + $0x17]] }
  0x4e   : > { %323 = vrot.lane.b32.xlu0 %v321_v54, %s1032_s26  ;;  %v437_v59 = vadd.f32 %v436_v52, %v433_v55  ;;  %v515_v61 = vmul.f32 %v1170_v1, %v514_v58  ;;  %v518_v62 = vstv %s784_s23  ;;  %s774_s22 = sld [smem:[#allocation2 + $0x24]] }
  0x4f   : > { %v519_v63 = vmul.f32 %v1172_v2, %v518_v62  ;;  %v522_v3 = vstv %s785_s5  ;;  %s775_s4 = sld [smem:[#allocation2 + $0x27]] }
  0x50   : > { %v516_v5 = vadd.f32 %v515_v61, %v512_v57  ;;  %v523_v6 = vmul.f32 %v1174_v4, %v522_v3  ;;  %v345_v7 = vstv %s756_s8  ;;  %s776_s9 = sld [smem:[#allocation2 + $0x2a]]  ;;  %v441_v10 = vadd.f32 %v440_v60, %v437_v59 }
  0x51   : > { %v346_v8 = vmul.f32 %v345_v7, %v1168_v0  ;;  %v348_v9 = vstv %s757_s30  ;;  %s777_s19 = sld [smem:[#allocation2 + $0x2d]] }
  0x52   : > { %v520_v11 = vadd.f32 %v519_v63, %v516_v5  ;;  %v349_v12 = vmul.f32 %v1170_v1, %v348_v9  ;;  %v352_v13 = vstv %s758_s7  ;;  %s740_s20 = sld [smem:[#allocation2 + $0x1]] }
  0x53   : > { %v353_v14 = vmul.f32 %v1172_v2, %v352_v13  ;;  %v356_v15 = vstv %s759_s10  ;;  %s741_s27 = sld [smem:[#allocation2 + $0x4]] }
  0x54   : > { %v524_v16 = vadd.f32 %v523_v6, %v520_v11  ;;  %v350_v17 = vadd.f32 %v349_v12, %v346_v8  ;;  %v357_v18 = vmul.f32 %v1174_v4, %v356_v15  ;;  %v474_v19 = vstv %s774_s22  ;;  %s742_s28 = sld [smem:[#allocation2 + $0x7]] }
  0x55   : > { %v475_v20 = vmul.f32 %v474_v19, %v1168_v0  ;;  %v477_v21 = vstv %s775_s4  ;;  %s752_s29 = sld [smem:[#allocation2 + $0xd]] }
  0x56   : > { %443 = vrot.lane.b32.xlu0 %v441_v10, %s1033_s6  ;;  %526 = vrot.lane.b32.xlu1 %v524_v16, %s1033_s6  ;;  %v354_v22 = vadd.f32 %v353_v14, %v350_v17  ;;  %v478_v23 = vmul.f32 %v1170_v1, %v477_v21  ;;  %v481_v24 = vstv %s776_s9  ;;  %s753_s23 = sld [smem:[#allocation2 + $0x10]] }
  0x57   : > { %v482_v25 = vmul.f32 %v1172_v2, %v481_v24  ;;  %v485_v26 = vstv %s777_s19  ;;  %s743_s5 = sld [smem:[#allocation2 + $0xa]] }
  0x58   : > { %v358_v27 = vadd.f32 %v357_v18, %v354_v22  ;;  %v479_v28 = vadd.f32 %v478_v23, %v475_v20  ;;  %v486_v30 = vmul.f32 %v1174_v4, %v485_v26  ;;  %v245_v32 = vstv %s740_s20  ;;  %s754_s8 = sld [smem:[#allocation2 + $0x13]]  ;;  %s1257_s20 = scalar_lea.vmem [#allocation7], %s731_s17 }
  0x59   : > { %v248_v33 = vstv %s741_s27  ;;  %s778_s30 = sld [smem:[#allocation2 + $0x25]]  ;;  %v246_v34 = vmul.f32 %v245_v32, %v1168_v0  ;;  %s588_s17 = sshll.u32 %s1257_s20, 4  ;;  %s589_s17 = int_to_ptr.vmem [resolvable:$true] %s588_s17 }
  0x5a   : > { %360 = vrot.lane.b32.xlu2 %v358_v27, %s1033_s6  ;;  %v483_v29 = vadd.f32 %v482_v25, %v479_v28  ;;  %s779_s7 = sld [smem:[#allocation2 + $0x28]]  ;;  %v249_v35 = vmul.f32 %v1170_v1, %v248_v33  ;;  %v252_v36 = vstv %s742_s28  ;;  %s789_s27 = sshll.u32 %s1078_s16, 3 }
  0x5b   : > { %s1219_s10 = sld [smem:[#allocation2 + $0x19]]  ;;  %v329_v37 = vstv %s752_s29  ;;  %v253_v40 = vmul.f32 %v1172_v2, %v252_v36 }
  0x5c   : > { %v487_v31 = vadd.f32 %v486_v30, %v483_v29  ;;  %s766_s6 = sld [smem:[#allocation2 + $0x1c]]  ;;  %v332_v38 = vstv %s753_s23  ;;  %v250_v39 = vadd.f32 %v249_v35, %v246_v34  ;;  %v330_v42 = vmul.f32 %v329_v37, %v1168_v0  ;;  %s587_s23 = scalar_lea.hbm %s1335_s2, %s789_s27 }
  0x5d   : > { %s1225_s22 = sld [smem:[#allocation2 + $0x2b]]  ;;  %v256_v41 = vstv %s743_s5  ;;  %v333_v43 = vmul.f32 %v1170_v1, %v332_v38  ;;  %s590_s5 = sshll.u32 %s587_s23, 4  ;;  %s591_s5 = int_to_ptr.hbm [resolvable:$true] %s590_s5 }
  0x5e   : > { %s1228_s4 = sld [smem:[#allocation2 + $0x1f]]  ;;  %v336_v44 = vstv %s754_s8  ;;  %v254_v48 = vadd.f32 %v253_v40, %v250_v39  ;;  %v257_v49 = vmul.f32 %v1174_v4, %v256_v41  ;;  %s572_s8 = scalar_lea.sflag [#allocation4], %s1158_s11 }
  0x5f   : > { %v495_v45 = vstv %s778_s30  ;;  %s1232_s9 = sld [smem:[#allocation2 + $0x2e]]  ;;  %v334_v52 = vadd.f32 %v333_v43, %v330_v42  ;;  %v337_v53 = vmul.f32 %v1172_v2, %v336_v44  ;;  %s938_s30 = sshra.s32 %s591_s5, 4  ;;  %s939_s30 = int_to_ptr.hbm [resolvable:$true] %s938_s30 }
  0x60   : > { %v498_v46 = vstv %s779_s7  ;;  %s1236_s19 = sld [smem:[#allocation2 + $0x22]]  ;;  %v496_v54 = vmul.f32 %v495_v45, %v1168_v0  ;;  %v258_v60 = vadd.f32 %v257_v49, %v254_v48  ;;  %s940_s7 = scalar_lea.hbm %s939_s30, 32 }
  0x61   : > { %v412_v50 = vstv %s1219_s10  ;;  %v499_v55 = vmul.f32 %v1170_v1, %v498_v46  ;;  %v338_v5 = vadd.f32 %v337_v53, %v334_v52  ;;  %p941_p4 = scmp.ne.s32.totalorder %s939_s30, %s940_s7  ;;  %p945_p0 = scmp.lt.s32.totalorder %s939_s30, %s1335_s2 }
  0x62   : > { %489 = vrot.lane.b32.xlu2 %v487_v31, %s1032_s26  ;;  %s1223_s26 = sld [smem:[#allocation2 + $0x16]]  ;;  %v415_v51 = vstv %s766_s6  ;;  %v413_v58 = vmul.f32 %v412_v50, %v1168_v0 }
  0x63   : > { %v502_v57 = vstv %s1225_s22  ;;  %v416_v59 = vmul.f32 %v1170_v1, %v415_v51  ;;  %v500_v7 = vadd.f32 %v499_v55, %v496_v54  ;;  %p942_p6 = pnand %p941_p4, %p1109_p11 }
  0x64   : > { %v419_v63 = vstv %s1228_s4  ;;  %v503_v8 = vmul.f32 %v1172_v2, %v502_v57 }
  0x65   : > { %v506_v9 = vstv %s1232_s9  ;;  %v417_v10 = vadd.f32 %v416_v59, %v413_v58  ;;  %v420_v0 = vmul.f32 %v1172_v2, %v419_v63  ;;  %p943_p13 = pneg %p942_p6 }
  0x66   : > { %v423_v12 = vstv %s1236_s19  ;;  %v504_v16 = vadd.f32 %v503_v8, %v500_v7  ;;  %v507_v17 = vmul.f32 %v1174_v4, %v506_v9 }
  0x67   : > { %v421_v18 = vadd.f32 %v420_v0, %v417_v10  ;;  %v424_v19 = vmul.f32 %v1174_v4, %v423_v12 }
  0x68   : > { %v340_v56 = vstv %s1223_s26  ;;  %v508_v26 = vadd.f32 %v507_v17, %v504_v16  ;;  %s944_s26 = scalar_lea.hbm %s1335_s2, 64 }
  0x69   : > { %v341_v6 = vmul.f32 %v1174_v4, %v340_v56  ;;  %v425_v28 = vadd.f32 %v424_v19, %v421_v18  ;;  %p946_p3 = scmp.lt.s32.totalorder %s944_s26, %s940_s7 }
  0x6b   : > { %v342_v15 = vadd.f32 %v341_v6, %v338_v5  ;;  %p947_p5 = por %p946_p3, %p945_p0 }
  0x6d   : > { %p948_p8 = pnand %p947_p5, %p943_p13 }
  0xb4   : > { %v407_v47 = vpop.permute.xlu1 %406  ;;  %v361_v62 = vpop.permute.xlu2 %360 }
  0xb5   : > { %v363_v24 = vsel %vm279_vm1, %v361_v62, 0.0  ;;  %v409_v30 = vsel %vm241_vm0, 0.0, %v407_v47 }
  0xb6   : > { %v426_v33 = vadd.f32 %v425_v28, %v409_v30 }
  0xb8   : > { %v239_v61 = vpop.permute.xlu0 %238 }
  0xb9   : > { %v242_v3 = vsel %vm241_vm0, 0.0, %v239_v61 }
  0xba   : > { %v259_v1 = vadd.f32 %v258_v60, %v242_v3 }
  0xbc   : > { %v277_v11 = vpop.permute.xlu1 %276  ;;  %v490_v22 = vpop.permute.xlu2 %489 }
  0xbd   : > { %v280_v13 = vsel %vm279_vm1, %v277_v11, 0.0  ;;  %v492_v27 = vsel %vm241_vm0, 0.0, %v490_v22 }
  0xbe   : > { %v281_v14 = vadd.f32 %v280_v13, %v259_v1  ;;  %v509_v32 = vadd.f32 %v508_v26, %v492_v27 }
  0xc0   : > { %283 = vst.msk [vmem:[%s1257_s20] sm:$0xff] %vm282_vm2, %v281_v14  ;;  %v324_v2 = vpop.permute.xlu0 %323  ;;  %v284_v20 = vsel %vm282_vm2, %v281_v14, 0.0  ;;  %v295_v21 = vmul.f32 %v281_v14, %v281_v14 }
  0xc1   : > { %v326_v23 = vsel %vm241_vm0, 0.0, %v324_v2  ;;  %285 = vadd.xlane.f32.xlu2 %v284_v20 }
  0xc2   : > { %v343_v25 = vadd.f32 %v342_v15, %v326_v23  ;;  %v296_v4 = vsel %vm282_vm2, %v295_v21, 0.0 }
  0xc3   : > { %297 = vadd.xlane.f32.xlu0 %v296_v4 }
  0xc4   : > { %v364_v29 = vadd.f32 %v363_v24, %v343_v25 }
  0xc6   : > { %760 = vst.msk [vmem:[%s1257_s20 + $0x8] sm:$0xff] %vm282_vm2, %v364_v29  ;;  %v367_v31 = vsel %vm282_vm2, %v364_v29, 0.0  ;;  %v378_v44 = vmul.f32 %v364_v29, %v364_v29 }
  0xc7   : > { %368 = vadd.xlane.f32.xlu1 %v367_v31 }
  0xc8   : > { %v444_v34 = vpop.permute.xlu0 %443  ;;  %v527_v35 = vpop.permute.xlu1 %526  ;;  %v379_v45 = vsel %vm282_vm2, %v378_v44, 0.0 }
  0xc9   : > { %v446_v36 = vsel %vm279_vm1, %v444_v34, 0.0  ;;  %v529_v37 = vsel %vm279_vm1, %v527_v35, 0.0 }
  0xca   : > { %v447_v38 = vadd.f32 %v446_v36, %v426_v33  ;;  %v530_v39 = vadd.f32 %v529_v37, %v509_v32 }
  0xcc   : > { %773 = vst.msk [vmem:[%s1257_s20 + $0x10] sm:$0xff] %vm282_vm2, %v447_v38  ;;  %v450_v40 = vsel %vm282_vm2, %v447_v38, 0.0  ;;  %v461_v41 = vmul.f32 %v447_v38, %v447_v38  ;;  %v533_v42 = vsel %vm282_vm2, %v530_v39, 0.0  ;;  %v544_v46 = vmul.f32 %v530_v39, %v530_v39 }
  0xcd   : > { %451 = vadd.xlane.f32.xlu2 %v450_v40  ;;  %786 = vst.msk [vmem:[%s1257_s20 + $0x18] sm:$0xff] %vm282_vm2, %v530_v39 }
  0xce   : > { %v462_v43 = vsel %vm282_vm2, %v461_v41, 0.0  ;;  %v545_v47 = vsel %vm282_vm2, %v544_v46, 0.0 }
  0xcf   : > { %463 = vadd.xlane.f32.xlu0 %v462_v43  ;;  %534 = vadd.xlane.f32.xlu1 %v533_v42 }
  0xd5   : > { %380 = vadd.xlane.f32.xlu2 %v379_v45 }
  0xdd   : > { %546 = vadd.xlane.f32.xlu2 %v545_v47 }
  0xde   : > { %951 = shalt.err (!%p948_p8)
}
  0xdf   : > { %s1034_s9 = smov 128   ;;  %s1035_s19 = smov 256   ;;  %vm557_vm3 = vcmask 15360   ;;  %vm559_vm4 = vcmask 23552   ;;  %vm567_vm5 = vcmask 1040384   ;;  %vm569_vm6 = vcmask 25600  }
  0xe0   : > { %s1036_s20 = smov 8   ;;  %s790_s30 = sshll.u32 %s1078_s16, 1 }
  0xe1   : > { %815 = dma.vmem_to_hbm [thread:$0]  (%p1109_p11), %s589_s17, 512, %s591_s5, %s572_s8, %s1034_s9, %s1035_s19, %s1036_s20  }
  0xe2   : > { %s733_s5 = sshll.u32 %s1158_s11, 1  ;;  %s603_s26 = scalar_lea.hbm %s1336_s3, %s790_s30 }
  0xe3   : > { %s214_s16 = scalar_lea.vmem [#allocation8], %s733_s5  ;;  %s607_s9 = sshll.u32 %s603_s26, 4  ;;  %s608_s9 = int_to_ptr.hbm [resolvable:$true] %s607_s9 }
  0xe4   : > { %s605_s4 = sshll.u32 %s214_s16, 4  ;;  %s577_s19 = scalar_lea.sflag [#allocation9], %s1158_s11  ;;  %s606_s4 = int_to_ptr.vmem [resolvable:$true] %s605_s4 }
  0xe5   : > { %s966_s20 = sshra.s32 %s608_s9, 4  ;;  %s967_s20 = int_to_ptr.hbm [resolvable:$true] %s966_s20 }
  0xe6   : > { %p973_p2 = scmp.lt.s32.totalorder %s967_s20, %s1336_s3 }
 0x134   : > { %v286_v48 = vpop.xlane.xlu2 %285 }
 0x135   : > { %v287_v49 = vrot.slane %v286_v48, 4 }
 0x136   : > { %v298_v50 = vpop.xlane.xlu0 %297 }
 0x137   : > { %v288_v51 = vadd.f32 %v287_v49, %v286_v48  ;;  %v299_v52 = vrot.slane %v298_v50, 4 }
 0x139   : > { %v289_v53 = vrot.slane %v288_v51, 2  ;;  %v300_v54 = vadd.f32 %v299_v52, %v298_v50 }
 0x13a   : > { %v369_v55 = vpop.xlane.xlu1 %368 }
 0x13b   : > { %v370_v56 = vrot.slane %v369_v55, 4  ;;  %v301_v57 = vrot.slane %v300_v54, 2  ;;  %v290_v58 = vadd.f32 %v289_v53, %v288_v51 }
 0x13d   : > { %v371_v59 = vadd.f32 %v370_v56, %v369_v55  ;;  %v291_v60 = vrot.slane %v290_v58, 1  ;;  %v302_v61 = vadd.f32 %v301_v57, %v300_v54 }
 0x13f   : > { %v372_v62 = vrot.slane %v371_v59, 2  ;;  %v292_v63 = vadd.f32 %v291_v60, %v290_v58  ;;  %v303_v3 = vrot.slane %v302_v61, 1 }
 0x140   : > { %v452_v5 = vpop.xlane.xlu2 %451 }
 0x141   : > { %v453_v6 = vrot.slane %v452_v5, 4  ;;  %793 = vpush %v292_v63  ;;  %v304_v7 = vadd.f32 %v303_v3, %v302_v61  ;;  %v373_v8 = vadd.f32 %v372_v62, %v371_v59 }
 0x142   : > { %v464_v9 = vpop.xlane.xlu0 %463  ;;  %v535_v10 = vpop.xlane.xlu1 %534 }
 0x143   : > { %v465_v0 = vrot.slane %v464_v9, 4  ;;  %795 = vpush %v304_v7  ;;  %v374_v1 = vrot.slane %v373_v8, 1  ;;  %v536_v11 = vrot.slane %v535_v10, 4  ;;  %v454_v12 = vadd.f32 %v453_v6, %v452_v5 }
 0x145   : > { %v466_v13 = vadd.f32 %v465_v0, %v464_v9  ;;  %v375_v14 = vadd.f32 %v374_v1, %v373_v8  ;;  %v537_v15 = vadd.f32 %v536_v11, %v535_v10  ;;  %v455_v16 = vrot.slane %v454_v12, 2 }
 0x147   : > { %797 = vpush %v375_v14  ;;  %v538_v17 = vrot.slane %v537_v15, 2  ;;  %v467_v19 = vrot.slane %v466_v13, 2  ;;  %v456_v22 = vadd.f32 %v455_v16, %v454_v12 }
 0x148   : > { %v381_v18 = vpop.xlane.xlu2 %380 }
 0x149   : > { %v382_v2 = vrot.slane %v381_v18, 4  ;;  %v539_v21 = vadd.f32 %v538_v17, %v537_v15  ;;  %v468_v23 = vadd.f32 %v467_v19, %v466_v13  ;;  %v457_v26 = vrot.slane %v456_v22, 1 }
 0x14b   : > { %v383_v20 = vadd.f32 %v382_v2, %v381_v18  ;;  %v540_v27 = vrot.slane %v539_v21, 1  ;;  %v469_v30 = vrot.slane %v468_v23, 1  ;;  %v458_v33 = vadd.f32 %v457_v26, %v456_v22 }
 0x14d   : > { %v384_v24 = vrot.slane %v383_v20, 2  ;;  %v541_v34 = vadd.f32 %v540_v27, %v539_v21  ;;  %v470_v36 = vadd.f32 %v469_v30, %v468_v23 }
 0x14f   : > { %v385_v25 = vadd.f32 %v384_v24, %v383_v20 }
 0x150   : > { %v547_v4 = vpop.xlane.xlu2 %546 }
 0x151   : > { %v548_v28 = vrot.slane %v547_v4, 4  ;;  %v386_v29 = vrot.slane %v385_v25, 1 }
 0x153   : > { %v549_v31 = vadd.f32 %v548_v28, %v547_v4  ;;  %v387_v32 = vadd.f32 %v386_v29, %v385_v25 }
 0x155   : > { %v550_v35 = vrot.slane %v549_v31, 2  ;;  %799 = vpush %v387_v32 }
 0x156   : > { %801 = vpush %v458_v33 }
 0x157   : > { %v551_v37 = vadd.f32 %v550_v35, %v549_v31  ;;  %803 = vpush %v470_v36 }
 0x158   : > { %805 = vpush %v541_v34 }
 0x159   : > { %v552_v38 = vrot.slane %v551_v37, 1 }
 0x15b   : > { %v553_v39 = vadd.f32 %v552_v38, %v551_v37 }
 0x15d   : > { %807 = vpush %v553_v39 }
 0x172   : > { %s794_s17 = spop %793 }
 0x173   : > { %v294_v46 = vstv %s794_s17  ;;  %s968_s17 = scalar_lea.hbm %s967_s20, 2 }
 0x174   : > { %s796_s27 = spop %795  ;;  %p969_p9 = scmp.ne.s32.totalorder %s967_s20, %s968_s17 }
 0x175   : > { %v306_v41 = vstv %s796_s27 }
 0x176   : > { %p970_p10 = pnand %p969_p9, %p1109_p11 }
 0x178   : > { %s798_s28 = spop %797  ;;  %p971_p1 = pneg %p970_p10 }
 0x179   : > { %v377_v42 = vstv %s798_s28 }
 0x17a   : > { %v556_v47 = vsel %vm241_vm0, %v294_v46, %v377_v42 }
 0x186   : > { %s800_s29 = spop %799 }
 0x187   : > { %s802_s23 = spop %801  ;;  %v389_v40 = vstv %s800_s29  ;;  %s972_s29 = scalar_lea.hbm %s1336_s3, 4 }
 0x188   : > { %s804_s8 = spop %803  ;;  %v561_v43 = vsel %vm241_vm0, %v306_v41, %v389_v40  ;;  %v460_v44 = vstv %s802_s23  ;;  %p974_p7 = scmp.lt.s32.totalorder %s972_s29, %s968_s17 }
 0x189   : > { %v472_v45 = vstv %s804_s8  ;;  %s806_s7 = spop %805  ;;  %v558_v48 = vsel %vm557_vm3, %v556_v47, %v460_v44 }
 0x18a   : > { %v562_v49 = vsel %vm557_vm3, %v561_v43, %v472_v45  ;;  %v543_v50 = vstv %s806_s7  ;;  %p975_p4 = por %p974_p7, %p973_p2 }
 0x18b   : > { %v560_v54 = vsel %vm559_vm4, %v558_v48, %v543_v50 }
 0x18c   : > { %p976_p6 = pnand %p975_p4, %p971_p1 }
 0x18e   : > { %s808_s22 = spop %807 }
 0x18f   : > { %v555_v51 = vstv %s808_s22 }
 0x190   : > { %v563_v52 = vsel %vm559_vm4, %v562_v49, %v555_v51 }
 0x191   : > { %v565_v53 = vrot.slane %v563_v52, 7 }
 0x193   : > { %v568_v55 = vsel %vm567_vm5, %v560_v54, %v565_v53 }
 0x194   : > { %570 = vst.msk [vmem:[%s214_s16] sm:$0x3] %vm569_vm6, %v568_v55 }
 0x195   : > { %979 = shalt.err (!%p976_p6)
}
 0x196   : > { %816 = dma.vmem_to_hbm [thread:$0]  (%p1109_p11), %s606_s4, 32, %s608_s9, %s577_s19  }
 0x197 PF: > { %s619_s11 = sand.u32 1, %s1014_s12   ;;  %p1343_p13 = scmp.ge.s32.totalorder %s1026_s15, 2 }
 0x198   : > { %s620_s8 = scalar_lea.sflag [#allocation4], %s619_s11 }
 0x199   : > { %p828_p0 = pnand %p1343_p13, %p1113_p12 }
 0x19b   : > { %p829_p3 = pneg %p828_p0 }
 0x19d   : > { %1005 = dma.done.wait (%p829_p3), %s620_s8, 512  }
 0x19e   : > { %1007 = vsyncadd (%p829_p3), %s620_s8, 4294966784  ;;  %s630_s30 = scalar_lea.sflag [#allocation9], %s619_s11 }
 0x19f   : > { %1009 = dma.done.wait (%p829_p3), %s630_s30, 32  }
 0x1a0   : > { %1011 = vsyncadd (%p829_p3), %s630_s30, 4294967264  ;;  %p21_p11 = scmp.ge.s32.totalorder %s1082_s18, 4   ;;  %s1344_s12 = smov %s1018_s13 }
 0x1a1   : > { %s1345_s13 = smov %s1022_s14  ;;  %s1346_s14 = smov %s1094_s21 }
 0x1a2   : > { %s1347_s15 = smov %s1082_s18  ;;  %23 = sbr.rel (!%p21_p11) target bundleno = 8 (0x8), region = 101 }
 0x1a7   :  { %636 = vsyncpa [#allocation3], 1 }
 0x1a8   :  { %638 = vsyncpa [#allocation3 + $0x1], 1 }
 0x1a9   :  { %639 = vsyncpa [#allocation4], 1 }
 0x1aa   :  { %641 = vsyncpa [#allocation4 + $0x1], 1 }
 0x1ab   :  { %642 = vsyncpa [#allocation9], 1 }
 0x1ac   :  { %644 = vsyncpa [#allocation9 + $0x1], 1 }
 0x1ad   :  { %645 = vsyncpa [#allocation5], 1 }
 0x1ae   :  { %647 = vsyncpa [#allocation5 + $0x1], 1 }

</bundles_post_ra>
